<compile_context>
chip_gen: v7x
topology: tpu7x:2x2x1
jax: 0.10.0
libtpu: 0.0.40
codegen_flags: <defaults>
</compile_context>

<pallas_src>
import math
import jax
import jax.numpy as jnp
from jax.experimental import pallas as pl
from jax.experimental.pallas import tpu as pltpu

INPUT_DIM = 128   # EmbedFC input_dim
EMB_DIM = 128     # EmbedFC emb_dim


# ------------------------------- Pallas kernel -------------------------------
def embedfc_kernel(x_ref, w1_ref, b1_ref, alpha_ref, w2_ref, b2_ref, out_ref):
    """Fused Linear -> PReLU -> Linear over the flattened (M, input_dim) batch."""
    x = x_ref[...]                                   # (M, D) f32
    a = alpha_ref[0]                                 # PReLU slope (scalar, SMEM)

    # Linear 1: bf16 operands on the MXU, f32 accumulation, f32 bias add.
    h = jnp.dot(x.astype(jnp.bfloat16), w1_ref[...],
                preferred_element_type=jnp.float32) + b1_ref[...]   # (M, E)

    # PReLU (single shared slope, as nn.PReLU() default), f32 on the VPU.
    h = jnp.where(h >= 0.0, h, a * h)

    # Linear 2: bf16 operands, f32 accumulation, f32 bias add.
    out = jnp.dot(h.astype(jnp.bfloat16), w2_ref[...],
                  preferred_element_type=jnp.float32) + b2_ref[...]  # (M, E)

    out_ref[...] = out


# --------------------------------- wrapper -----------------------------------
def embedfc_forward(x, w1_bf16, b1, alpha, w2_bf16, b2):
    """Equivalent of EmbedFC.forward: x.view(-1, input_dim) -> MLP."""
    m = x.size // INPUT_DIM
    x2d = x.reshape(m, INPUT_DIM)                    # == x.view(-1, input_dim)

    return pl.pallas_call(
        embedfc_kernel,
        out_shape=jax.ShapeDtypeStruct((m, EMB_DIM), jnp.float32),
        in_specs=[
            pl.BlockSpec(memory_space=pltpu.MemorySpace.VMEM),   # x (flattened)
            pl.BlockSpec(memory_space=pltpu.MemorySpace.VMEM),   # w1 (bf16)
            pl.BlockSpec(memory_space=pltpu.MemorySpace.VMEM),   # b1
            pl.BlockSpec(memory_space=pltpu.MemorySpace.SMEM),   # PReLU slope
            pl.BlockSpec(memory_space=pltpu.MemorySpace.VMEM),   # w2 (bf16)
            pl.BlockSpec(memory_space=pltpu.MemorySpace.VMEM),   # b2
        ],
        out_specs=pl.BlockSpec(memory_space=pltpu.MemorySpace.VMEM),
    )(x2d, w1_bf16, b1, alpha, w2_bf16, b2)


def init_embedfc_params(key):
    """PyTorch-style Linear init (uniform +/- 1/sqrt(fan_in)); PReLU slope 0.25."""
    k1, k2, k3, k4 = jax.random.split(key, 4)
    bound1 = 1.0 / math.sqrt(INPUT_DIM)
    w1 = jax.random.uniform(k1, (INPUT_DIM, EMB_DIM), jnp.float32, -bound1, bound1)
    b1 = jax.random.uniform(k2, (1, EMB_DIM), jnp.float32, -bound1, bound1)
    bound2 = 1.0 / math.sqrt(EMB_DIM)
    w2 = jax.random.uniform(k3, (EMB_DIM, EMB_DIM), jnp.float32, -bound2, bound2)
    b2 = jax.random.uniform(k4, (1, EMB_DIM), jnp.float32, -bound2, bound2)
    alpha = jnp.full((1,), 0.25, jnp.float32)        # nn.PReLU() default
    return w1, b1, alpha, w2, b2


if __name__ == "__main__":
    key = jax.random.PRNGKey(0)
    k_x, k_p = jax.random.split(key)

    # Small, lane-aligned input: x.view(-1, 128) -> (16, 128) (M = 16 rows).
    x = jax.random.normal(k_x, (2, 8, INPUT_DIM), jnp.float32)

    # Parameters built once (hoisted out of the forward path); weights cast to
    # bf16 once so the kernel's weight DMA is halved.
    w1, b1, alpha, w2, b2 = init_embedfc_params(k_p)
    w1_bf16 = w1.astype(jnp.bfloat16)
    w2_bf16 = w2.astype(jnp.bfloat16)

    out = embedfc_forward(x, w1_bf16, b1, alpha, w2_bf16, b2)
    jax.block_until_ready(out)
    assert out.shape == (16, EMB_DIM)

    # Pure-JAX f32 reference of the PyTorch forward (loose tol for bf16 matmul).
    x2d = x.reshape(-1, INPUT_DIM)
    h_ref = x2d @ w1 + b1
    h_ref = jnp.where(h_ref >= 0.0, h_ref, 0.25 * h_ref)
    ref = h_ref @ w2 + b2
    assert jnp.allclose(out, ref, rtol=5e-2, atol=5e-2)

    print("KERNEL_OK")
</pallas_src>

<mosaic_0001>
module attributes {stable_mosaic.version = 11 : i64} {
  func.func @embedfc_kernel(%arg0: memref<16x128xf32, #tpu.memory_space<vmem>>, %arg1: memref<128x128xbf16, #tpu.memory_space<vmem>>, %arg2: memref<1x128xf32, #tpu.memory_space<vmem>>, %arg3: memref<1xf32, #tpu.memory_space<smem>>, %arg4: memref<128x128xbf16, #tpu.memory_space<vmem>>, %arg5: memref<1x128xf32, #tpu.memory_space<vmem>>, %arg6: memref<16x128xf32, #tpu.memory_space<vmem>>) attributes {dimension_semantics = [], scalar_prefetch = 0 : i64, scratch_operands = 0 : i64, tpu.core_type = #tpu.core_type<tc>} {
    %c0 = arith.constant 0 : index
    %c0_0 = arith.constant 0 : index
    %0 = vector.load %arg0[%c0, %c0_0] : memref<16x128xf32, #tpu.memory_space<vmem>>, vector<16x128xf32>
    %c0_1 = arith.constant 0 : index
    %1 = memref.load %arg3[%c0_1] : memref<1xf32, #tpu.memory_space<smem>>
    %2 = arith.truncf %0 : vector<16x128xf32> to vector<16x128xbf16>
    %c0_2 = arith.constant 0 : index
    %c0_3 = arith.constant 0 : index
    %3 = vector.load %arg1[%c0_2, %c0_3] : memref<128x128xbf16, #tpu.memory_space<vmem>>, vector<128x128xbf16>
    %cst = arith.constant dense<0.000000e+00> : vector<16x128xf32>
    %4 = tpu.matmul %2, %3, %cst {dimension_numbers = #tpu.dot_dimension_numbers<[1], [0], [0], [1], [0, 0, 1, 1], [], []>} : vector<16x128xbf16>, vector<128x128xbf16>, vector<16x128xf32> -> vector<16x128xf32>
    %c0_4 = arith.constant 0 : index
    %c0_5 = arith.constant 0 : index
    %5 = vector.load %arg2[%c0_4, %c0_5] : memref<1x128xf32, #tpu.memory_space<vmem>>, vector<1x128xf32>
    %6 = vector.broadcast %5 : vector<1x128xf32> to vector<16x128xf32>
    %7 = arith.addf %4, %6 : vector<16x128xf32>
    %cst_6 = arith.constant 0.000000e+00 : f32
    %8 = vector.broadcast %cst_6 : f32 to vector<16x128xf32>
    %9 = arith.cmpf oge, %7, %8 : vector<16x128xf32>
    %10 = vector.broadcast %1 : f32 to vector<16x128xf32>
    %11 = arith.mulf %10, %7 : vector<16x128xf32>
    %12 = arith.select %9, %7, %11 : vector<16x128xi1>, vector<16x128xf32>
    %13 = arith.truncf %12 : vector<16x128xf32> to vector<16x128xbf16>
    %c0_7 = arith.constant 0 : index
    %c0_8 = arith.constant 0 : index
    %14 = vector.load %arg4[%c0_7, %c0_8] : memref<128x128xbf16, #tpu.memory_space<vmem>>, vector<128x128xbf16>
    %cst_9 = arith.constant dense<0.000000e+00> : vector<16x128xf32>
    %15 = tpu.matmul %13, %14, %cst_9 {dimension_numbers = #tpu.dot_dimension_numbers<[1], [0], [0], [1], [0, 0, 1, 1], [], []>} : vector<16x128xbf16>, vector<128x128xbf16>, vector<16x128xf32> -> vector<16x128xf32>
    %c0_10 = arith.constant 0 : index
    %c0_11 = arith.constant 0 : index
    %16 = vector.load %arg5[%c0_10, %c0_11] : memref<1x128xf32, #tpu.memory_space<vmem>>, vector<1x128xf32>
    %17 = vector.broadcast %16 : vector<1x128xf32> to vector<16x128xf32>
    %18 = arith.addf %15, %17 : vector<16x128xf32>
    %c0_12 = arith.constant 0 : index
    %c0_13 = arith.constant 0 : index
    %19 = vector.load %arg6[%c0_12, %c0_13] : memref<16x128xf32, #tpu.memory_space<vmem>>, vector<16x128xf32>
    tpu.vector_store %arg6[%c0_12, %c0_13], %18 {strides = array<i32>} : memref<16x128xf32, #tpu.memory_space<vmem>>, vector<16x128xf32>,
    return
  }
}

</mosaic_0001>

<bundles_post_ra>
// kernel: tpu_custom_call.1
= control target key start
LH: loop header
LB: loop body
LE: loop exit
PB: predicated region body
PF: predicated region fallthrough
CT: control target
= control target key end

     0   :  { %12 = vsyncpa [#allocation4], 0  ;;  %s633_s0 = inlined_call_operand.hbm [shape: f32[16,128], index: 0, kind: input, shape index: {}]   ;;  %s634_s1 = inlined_call_operand.hbm [shape: bf16[128,128], index: 1, kind: input, shape index: {}]   ;;  %s635_s2 = inlined_call_operand.vmem [shape: f32[1,128], index: 2, kind: input, shape index: {}]   ;;  %s636_s3 = inlined_call_operand.<no memory space> [shape: f32[1], index: 3, kind: input, shape index: {}]   ;;  %s637_s4 = inlined_call_operand.hbm [shape: bf16[128,128], index: 4, kind: input, shape index: {}]   ;;  %s638_s5 = inlined_call_operand.vmem [shape: f32[1,128], index: 5, kind: input, shape index: {}]   ;;  %s639_s6 = inlined_call_operand.hbm [shape: f32[16,128], index: 6, kind: output, shape index: {}]  }
   0x1   :  { %13 = vsyncpa [#allocation7], 0 }
   0x2   :  { %14 = vsyncpa [#allocation5], 0  ;;  %s519_s21 = smov [#allocation6]   ;;  %s425_s25 = scalar_lea.hbm %s634_s1, 1024 }
   0x3   :  { %s32_s22 = sshll.u32 %s519_s21, 4  ;;  %p426_p0 = scmp.ne.s32.totalorder %s634_s1, %s425_s25  ;;  %s33_s22 = int_to_ptr.vmem [resolvable:$true] %s32_s22 }
   0x4   :  { %p429_p1 = scmp.lt.u32.totalorder %s425_s25, %s634_s1 }
   0x6   :  { %p431_p2 = pnand %p429_p1, %p426_p0 }
   0x8   :  { %434 = shalt.err (!%p431_p2)
}
   0x9   :  { %s435_s30 = scalar_lea.vmem %s33_s22, 1024  ;;  %p440_p4 = scmp.lt.s32.totalorder %s33_s22, %s33_s22 }
   0xa   :  { %p436_p3 = scmp.ne.s32.totalorder %s33_s22, %s435_s30  ;;  %p441_p5 = scmp.lt.s32.totalorder %s435_s30, %s435_s30 }
   0xc   :  { %p442_p6 = por %p441_p5, %p440_p4 }
   0xe   :  { %p443_p7 = pnand %p442_p6, %p436_p3 }
  0x10   :  { %446 = shalt.err (!%p443_p7)
}
  0x11   :  { %s520_s7 = smov 64   ;;  %s521_s8 = smov 4  }
  0x12   :  { %38 = dma.hbm_to_vmem [thread:$0]  %s634_s1, 1024, %s33_s22, [#allocation7], %s520_s7, %s520_s7, %s521_s8  }
  0x13   :  { %s522_s11 = smov [#allocation3]   ;;  %s447_s15 = scalar_lea.hbm %s633_s0, 256 }
  0x14   :  { %s20_s12 = sshll.u32 %s522_s11, 4  ;;  %p448_p8 = scmp.ne.s32.totalorder %s633_s0, %s447_s15  ;;  %s21_s12 = int_to_ptr.vmem [resolvable:$true] %s20_s12 }
  0x15   :  { %p451_p9 = scmp.lt.u32.totalorder %s447_s15, %s633_s0 }
  0x17   :  { %p453_p10 = pnand %p451_p9, %p448_p8 }
  0x19   :  { %456 = shalt.err (!%p453_p10)
}
  0x1a   :  { %s457_s20 = scalar_lea.vmem %s21_s12, 256  ;;  %p462_p12 = scmp.lt.s32.totalorder %s21_s12, %s21_s12 }
  0x1b   :  { %p458_p11 = scmp.ne.s32.totalorder %s21_s12, %s457_s20  ;;  %p463_p13 = scmp.lt.s32.totalorder %s457_s20, %s457_s20 }
  0x1d   :  { %p464_p0 = por %p463_p13, %p462_p12 }
  0x1f   :  { %p465_p1 = pnand %p464_p0, %p458_p11 }
  0x21   :  { %468 = shalt.err (!%p465_p1)
}
  0x22   :  { %s523_s1 = smov 128   ;;  %s524_s21 = smov 8  }
  0x23   :  { %26 = dma.hbm_to_vmem [thread:$0]  %s633_s0, 256, %s21_s12, [#allocation4], %s523_s1, %s523_s1, %s524_s21  }
  0x24   :  { %s525_s24 = smov [#allocation8]   ;;  %s469_s28 = scalar_lea.hbm %s637_s4, 1024 }
  0x25   :  { %s48_s25 = sshll.u32 %s525_s24, 4  ;;  %p470_p2 = scmp.ne.s32.totalorder %s637_s4, %s469_s28  ;;  %s49_s25 = int_to_ptr.vmem [resolvable:$true] %s48_s25 }
  0x26   :  { %p473_p3 = scmp.lt.u32.totalorder %s469_s28, %s637_s4 }
  0x28   :  { %p475_p4 = pnand %p473_p3, %p470_p2 }
  0x2a   :  { %478 = shalt.err (!%p475_p4)
}
  0x2b   :  { %s479_s11 = scalar_lea.vmem %s49_s25, 1024  ;;  %p484_p6 = scmp.lt.s32.totalorder %s49_s25, %s49_s25 }
  0x2c   :  { %p480_p5 = scmp.ne.s32.totalorder %s49_s25, %s479_s11  ;;  %p485_p7 = scmp.lt.s32.totalorder %s479_s11, %s479_s11 }
  0x2e   :  { %p486_p8 = por %p485_p7, %p484_p6 }
  0x30   :  { %p487_p9 = pnand %p486_p8, %p480_p5 }
  0x32   :  { %490 = shalt.err (!%p487_p9)
}
  0x33   :  { %54 = dma.hbm_to_vmem [thread:$0]  %s637_s4, 1024, %s49_s25, [#allocation7], %s520_s7, %s520_s7, %s521_s8  }
  0x34   :  { %513 = dma.done.wait [#allocation4], 256  }
  0x35   :  { %514 = vsyncadd [#allocation4], 4294967040 }
  0x36   :  { %515 = dma.done.wait [#allocation7], 2048  }
  0x37   :  { %516 = vsyncadd [#allocation7], 4294965248  ;;  %v526_v0 = vmov 0.0   ;;  %vm527_vm0 = vmmov 0   ;;  %v409_v1 = vld [vmem:[#allocation6] sm:$0xff]   ;;  %v410_v2 = vld [vmem:[#allocation6 + $0x8] sm:$0xff]   ;;  %v185_v22 = vstv %s636_s3 }
  0x38   :  { %359 = vmatprep.subr.bf16.mxu0 %v526_v0  ;;  %375 = vmatprep.mubr.msk.bf16.mxu0 %vm527_vm0, %v526_v0  ;;  %v411_v3 = vld [vmem:[#allocation6 + $0x10] sm:$0xff]   ;;  %v417_v4 = vld [vmem:[#allocation8] sm:$0xff]   ;;  %v412_v5 = vld [vmem:[#allocation6 + $0x18] sm:$0xff]   ;;  %s528_s15 = smov [#allocation9]  }
  0x39   :  { %379 = vmatprep.subr.bf16.mxu1 %v526_v0  ;;  %395 = vmatprep.mubr.msk.bf16.mxu1 %vm527_vm0, %v526_v0  ;;  %v418_v6 = vld [vmem:[#allocation8 + $0x8] sm:$0xff]   ;;  %v413_v7 = vld [vmem:[#allocation6 + $0x20] sm:$0xff]   ;;  %v419_v8 = vld [vmem:[#allocation8 + $0x10] sm:$0xff]   ;;  %s310_s3 = sshll.u32 %s528_s15, 4  ;;  %s311_s3 = int_to_ptr.vmem [resolvable:$true] %s310_s3 }
  0x3a   :  { %360 = vmatpush3.bf16.msra.mxu0 %v409_v1  ;;  %380 = vmatpush3.bf16.msra.mxu1 %v417_v4  ;;  %v414_v9 = vld [vmem:[#allocation6 + $0x28] sm:$0xff]   ;;  %v420_v10 = vld [vmem:[#allocation8 + $0x18] sm:$0xff]   ;;  %v415_v11 = vld [vmem:[#allocation6 + $0x30] sm:$0xff]   ;;  %s491_s16 = scalar_lea.vmem %s311_s3, 256  ;;  %p496_p11 = scmp.lt.s32.totalorder %s311_s3, %s311_s3 }
  0x3b   :  { %361 = vmatprep.subr.bf16.mxu0 %v526_v0  ;;  %381 = vmatprep.subr.bf16.mxu1 %v526_v0  ;;  %v421_v12 = vld [vmem:[#allocation8 + $0x20] sm:$0xff]   ;;  %v416_v13 = vld [vmem:[#allocation6 + $0x38] sm:$0xff]   ;;  %v67_v14 = vld [vmem:[#allocation3] sm:$0xff]  ;;  %p492_p10 = scmp.ne.s32.totalorder %s311_s3, %s491_s16  ;;  %p497_p12 = scmp.lt.s32.totalorder %s491_s16, %s491_s16 }
  0x3c   :  { %v68_v15 = vld [vmem:[#allocation3 + $0x8] sm:$0xff]  ;;  %v422_v16 = vld [vmem:[#allocation8 + $0x28] sm:$0xff]   ;;  %v423_v18 = vld [vmem:[#allocation8 + $0x30] sm:$0xff]  }
  0x3d   :  { %v70_v17 = vpack.c.bf16 %v68_v15, %v67_v14  ;;  %v424_v19 = vld [vmem:[#allocation8 + $0x38] sm:$0xff]   ;;  %v323_v20 = vld [vmem:[%s635_s2] ss:$0 sm:$0xff]  ;;  %p498_p13 = por %p497_p12, %p496_p11 }
  0x3e   :  { %362 = vmatpush3.bf16.msra.mxu0 %v410_v2  ;;  %382 = vmatpush3.bf16.msra.mxu1 %v418_v6  ;;  %v332_v33 = vld [vmem:[%s638_s5] ss:$0 sm:$0xff] }
  0x3f   :  { %363 = vmatprep.subr.bf16.mxu0 %v526_v0  ;;  %383 = vmatprep.subr.bf16.mxu1 %v526_v0  ;;  %p499_p0 = pnand %p498_p13, %p492_p10 }
  0x42   :  { %364 = vmatpush3.bf16.msra.mxu0 %v411_v3  ;;  %384 = vmatpush3.bf16.msra.mxu1 %v419_v8 }
  0x43   :  { %365 = vmatprep.subr.bf16.mxu0 %v526_v0  ;;  %385 = vmatprep.subr.bf16.mxu1 %v526_v0 }
  0x46   :  { %366 = vmatpush3.bf16.msra.mxu0 %v412_v5  ;;  %386 = vmatpush3.bf16.msra.mxu1 %v420_v10 }
  0x47   :  { %367 = vmatprep.subr.bf16.mxu0 %v526_v0  ;;  %387 = vmatprep.subr.bf16.mxu1 %v526_v0 }
  0x4a   :  { %368 = vmatpush3.bf16.msra.mxu0 %v413_v7  ;;  %388 = vmatpush3.bf16.msra.mxu1 %v421_v12 }
  0x4b   :  { %369 = vmatprep.subr.bf16.mxu0 %v526_v0  ;;  %389 = vmatprep.subr.bf16.mxu1 %v526_v0 }
  0x4e   :  { %370 = vmatpush3.bf16.msra.mxu0 %v414_v9  ;;  %390 = vmatpush3.bf16.msra.mxu1 %v422_v16 }
  0x4f   :  { %371 = vmatprep.subr.bf16.mxu0 %v526_v0  ;;  %391 = vmatprep.subr.bf16.mxu1 %v526_v0 }
  0x52   :  { %372 = vmatpush3.bf16.msra.mxu0 %v415_v11  ;;  %392 = vmatpush3.bf16.msra.mxu1 %v423_v18 }
  0x53   :  { %373 = vmatprep.subr.bf16.mxu0 %v526_v0  ;;  %393 = vmatprep.subr.bf16.mxu1 %v526_v0 }
  0x56   :  { %374 = vmatpush3.bf16.msra.mxu0 %v416_v13  ;;  %394 = vmatpush3.bf16.msra.mxu1 %v424_v19 }
  0x59   :  { %376 = vmatmul.mubr.bf16.vlgmr.msra.gmra.mrb[0].mxu0 %v70_v17 }
 0x12c   :  { %v176_v21 = vpop.f32.mrb[0].mxu0 }
 0x12d   :  { %v177_v23 = vadd.f32 %v323_v20, %v176_v21  ;;  %v377_v24 = vpop.f32.mrb[1].mxu0 }
 0x12e   :  { %v179_v25 = vpop.f32.mrb[2].mxu0 }
 0x12f   :  { %v186_v26 = vmul.f32 %v185_v22, %v177_v23  ;;  %v180_v27 = vadd.f32 %v323_v20, %v179_v25  ;;  %v378_v28 = vpop.f32.mrb[3].mxu0  ;;  %vm183_vm1 = vcmp.ge.f32.partialorder %v177_v23, 0.0 }
 0x131   :  { %vm184_vm2 = vcmp.ge.f32.partialorder %v180_v27, 0.0  ;;  %v187_v29 = vmul.f32 %v185_v22, %v180_v27  ;;  %v188_v30 = vsel %vm183_vm1, %v177_v23, %v186_v26 }
 0x133   :  { %v189_v31 = vsel %vm184_vm2, %v180_v27, %v187_v29 }
 0x134   :  { %v190_v32 = vpack.c.bf16 %v189_v31, %v188_v30 }
 0x136   :  { %396 = vmatmul.mubr.bf16.vlgmr.msra.gmra.mrb[0].mxu1 %v190_v32 }
 0x209   :  { %v296_v34 = vpop.f32.mrb[0].mxu1 }
 0x20a   :  { %v297_v35 = vadd.f32 %v332_v33, %v296_v34  ;;  %v397_v36 = vpop.f32.mrb[1].mxu1 }
 0x20b   :  { %v299_v37 = vpop.f32.mrb[2].mxu1 }
 0x20c   :  { %303 = vst [vmem:[#allocation9] sm:$0xff] %v297_v35  ;;  %v300_v38 = vadd.f32 %v332_v33, %v299_v37  ;;  %v398_v39 = vpop.f32.mrb[3].mxu1 }
 0x20e   :  { %304 = vst [vmem:[#allocation9 + $0x8] sm:$0xff] %v300_v38 }
 0x20f   :  { %502 = shalt.err (!%p499_p0)
}
 0x210   :  { %s503_s18 = scalar_lea.hbm %s639_s6, 256 }
 0x211   :  { %p504_p1 = scmp.ne.s32.totalorder %s639_s6, %s503_s18  ;;  %p507_p2 = scmp.lt.u32.totalorder %s503_s18, %s639_s6 }
 0x213   :  { %p509_p3 = pnand %p507_p2, %p504_p1 }
 0x215   :  { %512 = shalt.err (!%p509_p3)
}
 0x216   :  { %316 = dma.vmem_to_hbm [thread:$0]  %s311_s3, 256, %s639_s6, [#allocation5], %s523_s1, %s523_s1, %s524_s21  }
 0x217   :  { %517 = dma.done.wait [#allocation5], 256  }
 0x218   :  { %518 = vsyncadd [#allocation5], 4294967040 }
 0x219   :  { %320 = vsyncpa [#allocation4], 1 }
 0x21a   :  { %321 = vsyncpa [#allocation7], 1 }
 0x21b   :  { %322 = vsyncpa [#allocation5], 1 }

</bundles_post_ra>
